<compile_context>
chip_gen: v7x
topology: tpu7x:2x2x1
jax: 0.10.0
libtpu: 0.0.40
codegen_flags: <defaults>
</compile_context>

<pallas_src>
import math
import numpy as np
import jax
import jax.numpy as jnp
from jax.experimental import pallas as pl
from jax.experimental.pallas import tpu as pltpu


# ---------------------------------------------------------------------------
# geneobj construction (verbatim semantics of GeneLayers.get_geneobj)
# ---------------------------------------------------------------------------
def get_geneobj(ensembl_ids, standard_gene_size):
    geneobj = {}
    di = 0
    for ci, eid in enumerate(ensembl_ids):
        feature = {"index": ci, "index_separted": (di, ci)}
        geneobj.setdefault(
            eid, {"inputs": [], "layersize": standard_gene_size}
        )["inputs"].append(feature)
    return geneobj


def _round_up(x, m):
    return ((x + m - 1) // m) * m


# ---------------------------------------------------------------------------
# Pallas kernels
# ---------------------------------------------------------------------------
def _gene_block_kernel_single(x_ref, w_ref, b_ref, o_ref):
    # k_tiles == 1 fast path: no accumulator, no init/finalize phases.
    o_ref[...] = jnp.maximum(
        jnp.dot(x_ref[...], w_ref[...], preferred_element_type=jnp.float32)
        + b_ref[...],
        0.0,
    ).astype(o_ref.dtype)


def _gene_block_kernel_acc(x_ref, w_ref, b_ref, o_ref, acc_ref):
    k = pl.program_id(2)

    @pl.when(k == 0)
    def _init():
        acc_ref[...] = jnp.zeros_like(acc_ref)

    acc_ref[...] += jnp.dot(
        x_ref[...], w_ref[...], preferred_element_type=jnp.float32
    )

    @pl.when(k == pl.num_programs(2) - 1)
    def _finalize():
        o_ref[...] = jnp.maximum(acc_ref[...] + b_ref[...], 0.0).astype(o_ref.dtype)


# ---------------------------------------------------------------------------
# Tile-size heuristics
# ---------------------------------------------------------------------------
_VMEM_BUDGET = 40 * 1024 * 1024   # working-set cap; leaves headroom on v7x (64 MiB)
_VMEM_LIMIT_CAP = 48 * 1024 * 1024


def _vmem_need_bytes(tm, tk_sub, tn, k_tiles):
    x_t = tm * tk_sub * 2          # bf16
    w_t = tk_sub * tn * 2          # bf16
    o_t = tm * tn * 4              # f32
    b_t = tn * 4
    acc = tm * tn * 4 if k_tiles > 1 else 0
    return 2 * (x_t + w_t + o_t + b_t) + acc   # double-buffered I/O + accumulator


def _pick_tm(B, n_blocks):
    if B <= 16:
        return _round_up(B, 16)        # bf16 packs 16 rows per sublane group
    if B <= 128:
        return 128
    # Weight-HBM bound: bigger M tile => fewer full-weight re-reads.
    tm = 512 if B > 256 else 256
    # v7x megacore: if the N axis can't feed 2 cores, keep >= 2 M tiles.
    if n_blocks < 2:
        while tm > 128 and pl.cdiv(B, tm) < 2:
            tm //= 2
    return tm


def gene_layers_forward(x, params):
    """x: (B, n_features) f32. Returns (B, n_genes * S) f32."""
    gidx = params["gather_idx"]          # (K_g,) int32
    w_blocks = params["w_blocks"]        # (n_blocks, tk_block, tn) bf16
    bias = params["bias"]                # (1, D_pad) f32
    tn = params["tn"]
    tk_sub = params["tk_sub"]
    d_valid = params["d_valid"]

    B = x.shape[0]
    n_blocks, tk_block, _ = w_blocks.shape
    D_pad = n_blocks * tn
    k_tiles = tk_block // tk_sub

    # Gather features into per-gene contiguous fixed-stride slots; bf16 halves
    # HBM/VMEM traffic (weights dominate bytes). Accumulation stays f32.
    x_g = jnp.take(x, gidx, axis=1).astype(jnp.bfloat16)

    # Pick the M tile, then shrink it if the double-buffered working set would
    # exceed the (v7x-safe) VMEM budget.
    tm = _pick_tm(B, n_blocks)
    while tm > 128 and _vmem_need_bytes(tm, tk_sub, tn, k_tiles) > _VMEM_BUDGET:
        tm //= 2
    B_pad = _round_up(B, tm)
    if B_pad != B:
        x_g = jnp.pad(x_g, ((0, B_pad - B), (0, 0)))

    m_tiles = B_pad // tm
    vmem_need = _vmem_need_bytes(tm, tk_sub, tn, k_tiles)
    vmem_limit = int(min(max(vmem_need + (4 << 20), 16 << 20), _VMEM_LIMIT_CAP))

    # Accurate advisory cost: weights (and bias) are re-streamed once per M tile.
    cost = pl.CostEstimate(
        flops=2 * B_pad * D_pad * tk_block,      # only non-zero blocks are computed
        transcendentals=0,
        bytes_accessed=(
            x_g.size * 2
            + w_blocks.size * 2 * m_tiles
            + bias.size * 4 * m_tiles
            + B_pad * D_pad * 4
        ),
    )

    out_shape = jax.ShapeDtypeStruct((B_pad, D_pad), jnp.float32)

    if k_tiles == 1:
        # ---- fast path: whole per-tile K extent in one step, no accumulator ----
        grid = (m_tiles, n_blocks)
        out = pl.pallas_call(
            _gene_block_kernel_single,
            out_shape=out_shape,
            grid_spec=pltpu.PrefetchScalarGridSpec(
                num_scalar_prefetch=0,
                grid=grid,
                in_specs=[
                    # x: K block depends on the N tile (block-diagonal sparsity).
                    pl.BlockSpec((tm, tk_block), lambda i, j: (i, j)),
                    # compact block-diagonal weights: one (tk_block, tn) slab per N tile.
                    pl.BlockSpec((None, tk_block, tn), lambda i, j: (j, 0, 0)),
                    pl.BlockSpec((1, tn), lambda i, j: (0, j)),
                ],
                out_specs=pl.BlockSpec((tm, tn), lambda i, j: (i, j)),
            ),
            compiler_params=pltpu.CompilerParams(
                dimension_semantics=("parallel", "parallel"),
                vmem_limit_bytes=vmem_limit,
            ),
            cost_estimate=cost,
        )(x_g, w_blocks, bias)
    else:
        # ---- general path: accumulate over K sub-tiles in a f32 VMEM scratch ----
        grid = (m_tiles, n_blocks, k_tiles)
        out = pl.pallas_call(
            _gene_block_kernel_acc,
            out_shape=out_shape,
            grid_spec=pltpu.PrefetchScalarGridSpec(
                num_scalar_prefetch=0,
                grid=grid,
                in_specs=[
                    pl.BlockSpec((tm, tk_sub), lambda i, j, k: (i, j * (tk_block // tk_sub) + k)),
                    pl.BlockSpec((None, tk_sub, tn), lambda i, j, k: (j, k, 0)),
                    # bias resident across the K axis (same block index for all k).
                    pl.BlockSpec((1, tn), lambda i, j, k: (0, j)),
                ],
                out_specs=pl.BlockSpec((tm, tn), lambda i, j, k: (i, j)),
                scratch_shapes=[pltpu.VMEM((tm, tn), jnp.float32)],
            ),
            compiler_params=pltpu.CompilerParams(
                dimension_semantics=("parallel", "parallel", "arbitrary"),
                vmem_limit_bytes=vmem_limit,
            ),
            cost_estimate=cost,
        )(x_g, w_blocks, bias)

    # Drop batch padding and the padded gene columns (lane-dense D_pad % 128 == 0).
    return out[:B, :d_valid]


# ---------------------------------------------------------------------------
# Parameter construction (deterministic, synthetic) in the compact
# block-diagonal layout + a dense reference for the correctness check.
# ---------------------------------------------------------------------------
def _layout_for_tn(geneobj, genes, S, tn):
    gpn = tn // S                                # genes per output N-tile
    i_max = max(len(geneobj[g]["inputs"]) for g in genes)
    step = 128 // math.gcd(gpn, 128)
    i_pad = _round_up(i_max, step)               # tk_block multiple of 128 by construction
    tk_block = gpn * i_pad
    n_genes_pad = _round_up(len(genes), gpn)
    n_blocks = n_genes_pad // gpn
    return {
        "tn": tn, "gpn": gpn, "i_pad": i_pad, "tk_block": tk_block,
        "n_genes_pad": n_genes_pad, "n_blocks": n_blocks,
        "weight_elems": n_blocks * tk_block * tn,
    }


def build_gene_params(ensembl_ids, standard_gene_size, key):
    geneobj = get_geneobj(ensembl_ids, standard_gene_size)
    genes = list(geneobj.keys())  # dict insertion order = first-appearance order
    n_genes = len(genes)
    S = standard_gene_size
    n_features = len(ensembl_ids)

    # Sweep tn and keep the layout with the smaller compact-weight footprint
    # (padding inside each block-diagonal tile scales with gpn = tn / S).
    candidates = [
        _layout_for_tn(geneobj, genes, S, tn)
        for tn in (256, 128)
        if tn % 128 == 0 and tn % S == 0
    ]
    assert candidates, "standard_gene_size must divide 128 or 256"
    layout = min(candidates, key=lambda c: c["weight_elems"])

    tn = layout["tn"]
    gpn = layout["gpn"]
    i_pad = layout["i_pad"]
    tk_block = layout["tk_block"]
    n_genes_pad = layout["n_genes_pad"]
    n_blocks = layout["n_blocks"]
    D_pad = n_genes_pad * S
    K_g = n_genes_pad * i_pad
    d_valid = n_genes * S

    kw, kb = jax.random.split(key)
    w_dense = np.asarray(jax.random.normal(kw, (n_features, d_valid), dtype=jnp.float32)) * 0.1
    mask = np.zeros((n_features, d_valid), dtype=np.float32)
    gather_idx = np.zeros((K_g,), dtype=np.int32)
    # Invariant: gather_idx padding slots point at feature 0; this is safe only
    # because the matching w_blocks rows/columns are ZERO. Keep it that way.
    w_blocks = np.zeros((n_blocks, tk_block, tn), dtype=np.float32)

    for g, eid in enumerate(genes):
        jb, p = divmod(g, gpn)
        for t, feat in enumerate(geneobj[eid]["inputs"]):
            f = feat["index"]
            mask[f, g * S:(g + 1) * S] = 1.0
            gather_idx[g * i_pad + t] = f
            w_blocks[jb, p * i_pad + t, p * S:(p + 1) * S] = w_dense[f, g * S:(g + 1) * S]

    w_masked = w_dense * mask
    bias_valid = np.asarray(jax.random.normal(kb, (1, d_valid), dtype=jnp.float32)) * 0.01
    bias = np.zeros((1, D_pad), dtype=np.float32)
    bias[:, :d_valid] = bias_valid

    # K sub-tile: take the full per-tile K extent when it fits (k_tiles == 1
    # fast path); otherwise the largest 128-multiple divisor up to 2048.
    tk_cap = 2048
    if tk_block <= tk_cap:
        tk_sub = tk_block
    else:
        tk_sub = 128
        for cand in range(tk_cap, 127, -128):
            if tk_block % cand == 0:
                tk_sub = cand
                break

    params = {
        "gather_idx": jnp.asarray(gather_idx),
        "w_blocks": jnp.asarray(w_blocks, dtype=jnp.bfloat16),
        "bias": jnp.asarray(bias),
        "tn": tn,
        "tk_sub": tk_sub,
        "d_valid": d_valid,
    }
    ref = {"w_masked": jnp.asarray(w_masked), "bias": jnp.asarray(bias_valid)}
    return params, ref, n_genes


# ---------------------------------------------------------------------------
# main
# ---------------------------------------------------------------------------
if __name__ == "__main__":
    standard_gene_size = 4
    # 16 input features mapping onto 12 unique genes (some genes get 2 inputs)
    ensembl_ids = ["ENSG%05d" % (i % 12) for i in range(16)]
    batch = 8

    key = jax.random.PRNGKey(0)
    kx, kp = jax.random.split(key)
    x = jax.random.normal(kx, (batch, len(ensembl_ids)), dtype=jnp.float32)

    params, ref_params, n_genes = build_gene_params(ensembl_ids, standard_gene_size, kp)

    out = gene_layers_forward(x, params)
    out = jax.block_until_ready(out)

    # pure-JAX f32 reference (bf16 operands in the kernel -> looser tolerance)
    ref = jnp.maximum(jnp.dot(x, ref_params["w_masked"]) + ref_params["bias"], 0.0)
    assert out.shape == (batch, n_genes * standard_gene_size)
    np.testing.assert_allclose(np.asarray(out), np.asarray(ref), rtol=2e-2, atol=2e-2)

    print("KERNEL_OK")
</pallas_src>

<mosaic_0001>
module attributes {stable_mosaic.version = 11 : i64} {
  func.func @_gene_block_kernel_single(%arg0: i32, %arg1: i32, %arg2: memref<16x128xbf16, #tpu.memory_space<vmem>>, %arg3: memref<1x128x128xbf16, #tpu.memory_space<vmem>>, %arg4: memref<1x128xf32, #tpu.memory_space<vmem>>, %arg5: memref<16x128xf32, #tpu.memory_space<vmem>>) attributes {dimension_semantics = [#tpu.dimension_semantics<parallel>, #tpu.dimension_semantics<parallel>], iteration_bounds = array<i64: 1, 1>, scalar_prefetch = 0 : i64, scratch_operands = 0 : i64, tpu.core_type = #tpu.core_type<tc>, window_params = [{transform_indices = @transform_0, window_bounds = array<i64: 16, 128>}, {transform_indices = @transform_1, window_bounds = array<i64: 1, 128, 128>}, {transform_indices = @transform_2, window_bounds = array<i64: 1, 128>}, {transform_indices = @transform_3, window_bounds = array<i64: 16, 128>}]} {
    %c0 = arith.constant 0 : index
    %c0_0 = arith.constant 0 : index
    %0 = vector.load %arg2[%c0, %c0_0] : memref<16x128xbf16, #tpu.memory_space<vmem>>, vector<16x128xbf16>
    %c0_1 = arith.constant 0 : index
    %c0_2 = arith.constant 0 : index
    %c0_3 = arith.constant 0 : index
    %1 = vector.load %arg3[%c0_1, %c0_2, %c0_3] : memref<1x128x128xbf16, #tpu.memory_space<vmem>>, vector<1x128x128xbf16>
    %2 = vector.shape_cast %1 : vector<1x128x128xbf16> to vector<128x128xbf16>
    %cst = arith.constant dense<0.000000e+00> : vector<16x128xf32>
    %3 = tpu.matmul %0, %2, %cst {dimension_numbers = #tpu.dot_dimension_numbers<[1], [0], [0], [1], [0, 0, 1, 1], [], []>} : vector<16x128xbf16>, vector<128x128xbf16>, vector<16x128xf32> -> vector<16x128xf32>
    %c0_4 = arith.constant 0 : index
    %c0_5 = arith.constant 0 : index
    %4 = vector.load %arg4[%c0_4, %c0_5] : memref<1x128xf32, #tpu.memory_space<vmem>>, vector<1x128xf32>
    %5 = vector.broadcast %4 : vector<1x128xf32> to vector<16x128xf32>
    %6 = arith.addf %3, %5 : vector<16x128xf32>
    %cst_6 = arith.constant 0.000000e+00 : f32
    %7 = vector.broadcast %cst_6 : f32 to vector<16x128xf32>
    %8 = arith.maximumf %6, %7 : vector<16x128xf32>
    %c0_7 = arith.constant 0 : index
    %c0_8 = arith.constant 0 : index
    %9 = vector.load %arg5[%c0_7, %c0_8] : memref<16x128xf32, #tpu.memory_space<vmem>>, vector<16x128xf32>
    tpu.vector_store %arg5[%c0_7, %c0_8], %8 {strides = array<i32>} : memref<16x128xf32, #tpu.memory_space<vmem>>, vector<16x128xf32>,
    return
  }
  func.func @transform_0(%arg0: i32, %arg1: i32) -> (i32, i32) {
    %c0_i32 = arith.constant 0 : i32
    return %arg0, %arg1 : i32, i32
  }
  func.func @transform_1(%arg0: i32, %arg1: i32) -> (i32, i32, i32) {
    %c0_i32 = arith.constant 0 : i32
    %c0_i32_0 = arith.constant 0 : i32
    %c0_i32_1 = arith.constant 0 : i32
    return %arg1, %c0_i32, %c0_i32_0 : i32, i32, i32
  }
  func.func @transform_2(%arg0: i32, %arg1: i32) -> (i32, i32) {
    %c0_i32 = arith.constant 0 : i32
    %c0_i32_0 = arith.constant 0 : i32
    return %c0_i32, %arg1 : i32, i32
  }
  func.func @transform_3(%arg0: i32, %arg1: i32) -> (i32, i32) {
    %c0_i32 = arith.constant 0 : i32
    return %arg0, %arg1 : i32, i32
  }
}

</mosaic_0001>

<bundles_post_ra>
// kernel: tpu_custom_call.1
= control target key start
LH: loop header
LB: loop body
LE: loop exit
PB: predicated region body
PF: predicated region fallthrough
CT: control target
= control target key end

     0   :  { %8 = vsyncpa [#allocation3], 0  ;;  %s383_s0 = inlined_call_operand.hbm [shape: bf16[16,128], index: 0, kind: input, shape index: {}]   ;;  %s384_s1 = inlined_call_operand.hbm [shape: bf16[1,128,128], index: 1, kind: input, shape index: {}]   ;;  %s385_s2 = inlined_call_operand.vmem [shape: f32[1,128], index: 2, kind: input, shape index: {}]   ;;  %s386_s3 = inlined_call_operand.hbm [shape: f32[16,128], index: 3, kind: output, shape index: {}]  }
   0x1   :  { %9 = vsyncpa [#allocation6], 0 }
   0x2   :  { %10 = vsyncpa [#allocation4], 0  ;;  %s315_s12 = smov [#allocation2]   ;;  %s243_s16 = scalar_lea.hbm %s383_s0, 128 }
   0x3   :  { %s16_s13 = sshll.u32 %s315_s12, 4  ;;  %p244_p0 = scmp.ne.s32.totalorder %s383_s0, %s243_s16  ;;  %s17_s13 = int_to_ptr.vmem [resolvable:$true] %s16_s13 }
   0x4   :  { %p247_p1 = scmp.lt.u32.totalorder %s243_s16, %s383_s0 }
   0x6   :  { %p249_p2 = pnand %p247_p1, %p244_p0 }
   0x8   :  { %252 = shalt.err (!%p249_p2)
}
   0x9   :  { %s253_s21 = scalar_lea.vmem %s17_s13, 128  ;;  %p258_p4 = scmp.lt.s32.totalorder %s17_s13, %s17_s13 }
   0xa   :  { %p254_p3 = scmp.ne.s32.totalorder %s17_s13, %s253_s21  ;;  %p259_p5 = scmp.lt.s32.totalorder %s253_s21, %s253_s21 }
   0xc   :  { %p260_p6 = por %p259_p5, %p258_p4 }
   0xe   :  { %p261_p7 = pnand %p260_p6, %p254_p3 }
  0x10   :  { %264 = shalt.err (!%p261_p7)
}
  0x11   :  { %s316_s22 = smov 64   ;;  %s317_s23 = smov 4  }
  0x12   :  { %22 = dma.hbm_to_vmem [thread:$0]  %s383_s0, 128, %s17_s13, [#allocation3], %s316_s22, %s316_s22, %s317_s23  }
  0x13   :  { %s318_s26 = smov [#allocation5]   ;;  %s265_s30 = scalar_lea.hbm %s384_s1, 1024 }
  0x14   :  { %s28_s27 = sshll.u32 %s318_s26, 4  ;;  %p266_p8 = scmp.ne.s32.totalorder %s384_s1, %s265_s30  ;;  %s29_s27 = int_to_ptr.vmem [resolvable:$true] %s28_s27 }
  0x15   :  { %p269_p9 = scmp.lt.u32.totalorder %s265_s30, %s384_s1 }
  0x17   :  { %p271_p10 = pnand %p269_p9, %p266_p8 }
  0x19   :  { %274 = shalt.err (!%p271_p10)
}
  0x1a   :  { %s275_s8 = scalar_lea.vmem %s29_s27, 1024  ;;  %p280_p12 = scmp.lt.s32.totalorder %s29_s27, %s29_s27 }
  0x1b   :  { %p276_p11 = scmp.ne.s32.totalorder %s29_s27, %s275_s8  ;;  %p281_p13 = scmp.lt.s32.totalorder %s275_s8, %s275_s8 }
  0x1d   :  { %p282_p0 = por %p281_p13, %p280_p12 }
  0x1f   :  { %p283_p1 = pnand %p282_p0, %p276_p11 }
  0x21   :  { %286 = shalt.err (!%p283_p1)
}
  0x22   :  { %34 = dma.hbm_to_vmem [thread:$0]  %s384_s1, 1024, %s29_s27, [#allocation6], %s316_s22, %s316_s22, %s317_s23  }
  0x23   :  { %309 = dma.done.wait [#allocation3], 128  }
  0x24   :  { %310 = vsyncadd [#allocation3], 4294967168 }
  0x25   :  { %311 = dma.done.wait [#allocation6], 1024  }
  0x26   :  { %312 = vsyncadd [#allocation6], 4294966272  ;;  %v319_v0 = vmov 0.0   ;;  %vm320_vm0 = vmmov 0   ;;  %v234_v1 = vld [vmem:[#allocation5] sm:$0xff]   ;;  %v235_v2 = vld [vmem:[#allocation5 + $0x8] sm:$0xff]  }
  0x27   :  { %205 = vmatprep.subr.bf16.mxu0 %v319_v0  ;;  %221 = vmatprep.mubr.msk.bf16.mxu0 %vm320_vm0, %v319_v0  ;;  %v236_v3 = vld [vmem:[#allocation5 + $0x10] sm:$0xff]   ;;  %v237_v4 = vld [vmem:[#allocation5 + $0x18] sm:$0xff]   ;;  %v238_v5 = vld [vmem:[#allocation5 + $0x20] sm:$0xff]   ;;  %s321_s11 = smov [#allocation7]  }
  0x28   :  { %206 = vmatpush3.bf16.msra.mxu0 %v234_v1  ;;  %v239_v6 = vld [vmem:[#allocation5 + $0x28] sm:$0xff]   ;;  %v240_v7 = vld [vmem:[#allocation5 + $0x30] sm:$0xff]   ;;  %v241_v8 = vld [vmem:[#allocation5 + $0x38] sm:$0xff]   ;;  %s173_s12 = sshll.u32 %s321_s11, 4  ;;  %s174_s12 = int_to_ptr.vmem [resolvable:$true] %s173_s12 }
  0x29   :  { %207 = vmatprep.subr.bf16.mxu0 %v319_v0  ;;  %v242_v9 = vld [vmem:[#allocation2] sm:$0xff]   ;;  %s287_s13 = scalar_lea.vmem %s174_s12, 256  ;;  %p292_p3 = scmp.lt.s32.totalorder %s174_s12, %s174_s12 }
  0x2a   :  { %v186_v10 = vld [vmem:[%s385_s2] ss:$0 sm:$0xff]  ;;  %p288_p2 = scmp.ne.s32.totalorder %s174_s12, %s287_s13  ;;  %p293_p4 = scmp.lt.s32.totalorder %s287_s13, %s287_s13 }
  0x2c   :  { %208 = vmatpush3.bf16.msra.mxu0 %v235_v2  ;;  %p294_p5 = por %p293_p4, %p292_p3 }
  0x2d   :  { %209 = vmatprep.subr.bf16.mxu0 %v319_v0 }
  0x2e   :  { %p295_p6 = pnand %p294_p5, %p288_p2 }
  0x30   :  { %210 = vmatpush3.bf16.msra.mxu0 %v236_v3 }
  0x31   :  { %211 = vmatprep.subr.bf16.mxu0 %v319_v0 }
  0x34   :  { %212 = vmatpush3.bf16.msra.mxu0 %v237_v4 }
  0x35   :  { %213 = vmatprep.subr.bf16.mxu0 %v319_v0 }
  0x38   :  { %214 = vmatpush3.bf16.msra.mxu0 %v238_v5 }
  0x39   :  { %215 = vmatprep.subr.bf16.mxu0 %v319_v0 }
  0x3c   :  { %216 = vmatpush3.bf16.msra.mxu0 %v239_v6 }
  0x3d   :  { %217 = vmatprep.subr.bf16.mxu0 %v319_v0 }
  0x40   :  { %218 = vmatpush3.bf16.msra.mxu0 %v240_v7 }
  0x41   :  { %219 = vmatprep.subr.bf16.mxu0 %v319_v0 }
  0x44   :  { %220 = vmatpush3.bf16.msra.mxu0 %v241_v8 }
  0x47   :  { %222 = vmatmul.mubr.bf16.vlgmr.msra.gmra.mrb[0].mxu0 %v242_v9 }
 0x11a   :  { %v157_v11 = vpop.f32.mrb[0].mxu0 }
 0x11b   :  { %v158_v12 = vadd.f32 %v186_v10, %v157_v11  ;;  %v223_v13 = vpop.f32.mrb[1].mxu0 }
 0x11c   :  { %v160_v14 = vpop.f32.mrb[2].mxu0 }
 0x11d   :  { %v164_v15 = vmax.f32 %v158_v12, 0.0  ;;  %v161_v16 = vadd.f32 %v186_v10, %v160_v14  ;;  %v224_v17 = vpop.f32.mrb[3].mxu0 }
 0x11f   :  { %166 = vst [vmem:[#allocation7] sm:$0xff] %v164_v15  ;;  %v165_v18 = vmax.f32 %v161_v16, 0.0 }
 0x121   :  { %167 = vst [vmem:[#allocation7 + $0x8] sm:$0xff] %v165_v18 }
 0x122   :  { %298 = shalt.err (!%p295_p6)
}
 0x123   :  { %s299_s15 = scalar_lea.hbm %s386_s3, 256 }
 0x124   :  { %p300_p7 = scmp.ne.s32.totalorder %s386_s3, %s299_s15  ;;  %p303_p8 = scmp.lt.u32.totalorder %s299_s15, %s386_s3 }
 0x126   :  { %p305_p9 = pnand %p303_p8, %p300_p7 }
 0x128   :  { %308 = shalt.err (!%p305_p9)
}
 0x129   :  { %s322_s20 = smov 128   ;;  %s323_s21 = smov 8  }
 0x12a   :  { %179 = dma.vmem_to_hbm [thread:$0]  %s174_s12, 256, %s386_s3, [#allocation4], %s322_s20, %s322_s20, %s323_s21  }
 0x12b   :  { %313 = dma.done.wait [#allocation4], 256  }
 0x12c   :  { %314 = vsyncadd [#allocation4], 4294967040 }
 0x12d   :  { %183 = vsyncpa [#allocation3], 1 }
 0x12e   :  { %184 = vsyncpa [#allocation6], 1 }
 0x12f   :  { %185 = vsyncpa [#allocation4], 1 }

</bundles_post_ra>
